<compile_context>
chip_gen: v6e
topology: v6e:2x2x1
jax: 0.10.0
libtpu: 0.0.40
codegen_flags: <defaults>
</compile_context>

<pallas_src>
import functools

import jax
import jax.numpy as jnp
from jax.experimental import pallas as pl
from jax.experimental.pallas import tpu as pltpu


def _round_up(x, m):
    return (x + m - 1) // m * m


# ----------------------------- glue: rotation matrices -----------------------------
def _rotation_matrices(azimuth, elevation):
    """R = R_el @ R_az, shape (B, 3, 3). Exact port of apply_rotation()."""
    cos_az, sin_az = jnp.cos(azimuth), jnp.sin(azimuth)
    cos_el, sin_el = jnp.cos(elevation), jnp.sin(elevation)
    z = jnp.zeros_like(cos_az)
    o = jnp.ones_like(cos_az)
    R_az = jnp.stack([jnp.stack([cos_az, z, sin_az], -1),
                      jnp.stack([z, o, z], -1),
                      jnp.stack([-sin_az, z, cos_az], -1)], axis=1)     # (B,3,3)
    R_el = jnp.stack([jnp.stack([o, z, z], -1),
                      jnp.stack([z, cos_el, -sin_el], -1),
                      jnp.stack([z, sin_el, cos_el], -1)], axis=1)      # (B,3,3)
    return jnp.einsum('bij,bjk->bik', R_el, R_az)


# ----------------------------- the Pallas kernel -----------------------------
def _splat_kernel(pyf_ref, px_ref, out_ref, *, RH, Wp, BT, use_bf16):
    # pyf_ref: (BT, 2, TN)   rows = [py, masked feature], N on lanes (LHS: contraction on lanes)
    # px_ref : (BT, TN, 1)   px, N on sublanes (RHS: contraction on sublanes -> no transpose)
    # out_ref: (BT, RH, Wp)  resident across the point-tile axis (k) -> accumulator
    @pl.when(pl.program_id(2) == 0)
    def _():
        out_ref[...] = jnp.zeros_like(out_ref)

    # Ramps built once per grid step, shared by the BT batches (broadcast hoisted out of the loop).
    row0 = pl.program_id(1) * RH                                   # row-block offset (0 if no split)
    ys = (row0 + jax.lax.broadcasted_iota(jnp.int32, (RH, 1), 0)).astype(jnp.float32)   # (RH, 1)
    xs = jax.lax.broadcasted_iota(jnp.int32, (1, Wp), 1).astype(jnp.float32)            # (1, Wp)
    dot_dt = jnp.bfloat16 if use_bf16 else jnp.float32

    for b in range(BT):                      # BT <= 2, static unroll -> bounded live ranges
        pyf = pyf_ref[b]                     # (2, TN)
        py = pyf[0:1, :]                     # (1, TN)
        fm = pyf[1:2, :]                     # (1, TN)  masked feature
        # Feature folded into wy: fm broadcasts along sublanes (cheap direction) and removes a
        # TNxWp lane-broadcast multiply from the wx build.
        wy = jnp.maximum(0.0, 1.0 - jnp.abs(ys - py)) * fm         # (RH, TN)
        px_c = px_ref[b]                     # (TN, 1)
        wx = jnp.maximum(0.0, 1.0 - jnp.abs(xs - px_c))            # (TN, Wp)
        # f32 accumulate into the resident output block (MRB in-place accumulate on v7x).
        out_ref[b] += jnp.dot(wy.astype(dot_dt), wx.astype(dot_dt),
                              preferred_element_type=jnp.float32)


# ----------------------------- tiling heuristics -----------------------------
def _plan(B, N, H, W, use_bf16):
    Wp = _round_up(W, 128)
    # Batch tile, capped at 2 (keeps the unrolled per-batch loop's live ranges small).
    BT = 2 if (B % 2 == 0 and B >= 4) else 1
    # Guarantee >= 2 parallel output blocks for 2-TC chips (v7x): if the batch axis can't provide
    # them, split the output rows into 2 row-blocks (extra wx rebuild only in that case).
    if B // BT >= 2 or H < 16:
        n_rb, RH = 1, H
    else:
        n_rb = 2
        RH = _round_up(-(-H // 2), 8)
    Hp = n_rb * RH
    # Point tile: as large as the budget allows, to amortize the ~0.35us/step pipeline overhead
    # and per-dot MXU weight-load/drain.  Budget is safe on every generation (v7x: 64 MiB VMEM).
    budget = 24 * 1024 * 1024
    TN = min(2048, _round_up(N, 128))
    wdt = 2 if use_bf16 else 4                 # bf16-aware slab accounting

    def est(tn):
        return (2 * BT * RH * Wp * 4           # resident out block (+ writeback copy)
                + 2 * BT * 8 * tn * 4          # pyf tiles (2 rows pad to 8 sublanes), dbl-buffered
                + 2 * BT * tn * 128 * 4        # px tiles (lane-padded to 128), dbl-buffered
                + BT * (RH + Wp) * tn * wdt)   # wy / wx slabs fed to the MXU

    while TN > 128 and est(TN) > budget:
        TN = max(128, _round_up(TN // 2, 128))
    return BT, n_rb, RH, Hp, Wp, TN, est(TN)


# ----------------------------- wrapper -----------------------------
def render_point_cloud(points, azimuth, elevation, img_size, *, use_bf16=True):
    """points: (B, N, 3) f32; azimuth/elevation: (B,) radians -> (B, 3, H, W) f32."""
    B, N, _ = points.shape
    H = W = img_size

    # ---- per-point prologue in XLA (needs global-over-N z stats)
    pts = points.astype(jnp.float32)
    R = _rotation_matrices(azimuth, elevation).astype(jnp.float32)      # (B, 3, 3)
    rotated = jnp.einsum('bnj,bij->bni', pts, R)                        # points @ R^T
    xr, yr, zr = rotated[..., 0], rotated[..., 1], rotated[..., 2]
    z_min = jnp.min(zr, axis=1, keepdims=True)
    z_max = jnp.max(zr, axis=1, keepdims=True)
    feat = 0.3 + 0.7 * (zr - z_min) / (z_max - z_min + 1e-6)            # (B, N)
    px = (xr + 1.0) * 0.5 * W - 0.5
    py = (yr + 1.0) * 0.5 * H - 0.5
    px1 = jnp.floor(px)
    py1 = jnp.floor(py)
    inb = (px1 >= 0.0) & (py1 >= 0.0) & (px1 + 1.0 < W) & (py1 + 1.0 < H)
    fm = jnp.where(inb, feat, 0.0)                                      # masked features

    # ---- tiling / padding (zero-feature pad points contribute exactly nothing)
    BT, n_rb, RH, Hp, Wp, TN, est_bytes = _plan(B, N, H, W, use_bf16)
    Np = _round_up(N, TN)
    pad = Np - N
    if pad:
        px = jnp.pad(px, ((0, 0), (0, pad)))
        py = jnp.pad(py, ((0, 0), (0, pad)))
        fm = jnp.pad(fm, ((0, 0), (0, pad)))

    pyf_in = jnp.stack([py, fm], axis=1)                                # (B, 2, Np)  N on lanes
    px_in = px[:, :, None]                                              # (B, Np, 1)  N on sublanes

    kernel = functools.partial(_splat_kernel, RH=RH, Wp=Wp, BT=BT, use_bf16=use_bf16)
    vmem_limit = int(min(max(2 * est_bytes, 16 * 1024 * 1024), 40 * 1024 * 1024))

    img_p = pl.pallas_call(
        kernel,
        out_shape=jax.ShapeDtypeStruct((B, Hp, Wp), jnp.float32),
        grid_spec=pltpu.PrefetchScalarGridSpec(
            num_scalar_prefetch=0,
            grid=(B // BT, n_rb, Np // TN),
            in_specs=[
                pl.BlockSpec((BT, 2, TN), lambda i, r, k: (i, 0, k)),
                pl.BlockSpec((BT, TN, 1), lambda i, r, k: (i, k, 0)),
            ],
            out_specs=pl.BlockSpec((BT, RH, Wp), lambda i, r, k: (i, r, 0)),
        ),
        compiler_params=pltpu.CompilerParams(
            dimension_semantics=("parallel", "parallel", "arbitrary"),
            vmem_limit_bytes=vmem_limit),
    )(pyf_in, px_in)

    img = img_p[:, :H, :W]                                              # drop row/lane padding
    # replicate the grayscale splat to 3 channels (torch .expand)
    return jnp.broadcast_to(img[:, None, :, :], (B, 3, H, W))


# ----------------------------- pure-JAX reference (exact scatter port) -----------------------------
def reference_render(points, azimuth, elevation, img_size):
    B, N, _ = points.shape
    H = W = img_size
    R = _rotation_matrices(azimuth, elevation)
    rotated = jnp.einsum('bnj,bij->bni', points, R)          # points @ R^T
    z = rotated[..., 2]
    z_min = jnp.min(z, axis=1, keepdims=True)
    z_max = jnp.max(z, axis=1, keepdims=True)
    feat = 0.3 + 0.7 * (z - z_min) / (z_max - z_min + 1e-6)

    px = (rotated[..., 0] + 1) * 0.5 * W - 0.5
    py = (rotated[..., 1] + 1) * 0.5 * H - 0.5
    px1, py1 = jnp.floor(px), jnp.floor(py)
    px2, py2 = px1 + 1, py1 + 1
    w11 = (px2 - px) * (py2 - py)
    w12 = (px2 - px) * (py - py1)
    w21 = (px - px1) * (py2 - py)
    w22 = (px - px1) * (py - py1)
    mask = (px1 >= 0) & (py1 >= 0) & (px2 < W) & (py2 < H)
    fmask = jnp.where(mask, feat, 0.0)

    px1i = jnp.clip(px1, 0, W - 1).astype(jnp.int32)
    px2i = jnp.clip(px2, 0, W - 1).astype(jnp.int32)
    py1i = jnp.clip(py1, 0, H - 1).astype(jnp.int32)
    py2i = jnp.clip(py2, 0, H - 1).astype(jnp.int32)
    base = (jnp.arange(B, dtype=jnp.int32) * (H * W))[:, None]
    idx11 = base + py1i * W + px1i
    idx12 = base + py2i * W + px1i
    idx21 = base + py1i * W + px2i
    idx22 = base + py2i * W + px2i
    vals = jnp.stack([w11, w12, w21, w22], -1) * fmask[..., None]
    idx = jnp.stack([idx11, idx12, idx21, idx22], -1)
    image = jnp.zeros((B * H * W,), jnp.float32).at[idx.reshape(-1)].add(vals.reshape(-1))
    return jnp.broadcast_to(image.reshape(B, 1, H, W), (B, 3, H, W))


if __name__ == "__main__":
    # NOTE: the torch module has no learned parameters (only img_size), so there is nothing to init.
    key = jax.random.PRNGKey(0)
    B, N, img_size = 2, 256, 64
    k1, k2, k3 = jax.random.split(key, 3)
    points = jax.random.uniform(k1, (B, N, 3), jnp.float32, -0.8, 0.8)
    azimuth = jax.random.uniform(k2, (B,), jnp.float32, 0.0, 6.28318)
    elevation = jax.random.uniform(k3, (B,), jnp.float32, -0.5, 0.5)

    ref = reference_render(points, azimuth, elevation, img_size)

    # exact-precision path (f32 MXU operands) -> tight parity with the scatter reference
    out_f32 = jax.block_until_ready(
        render_point_cloud(points, azimuth, elevation, img_size, use_bf16=False))
    assert out_f32.shape == (B, 3, img_size, img_size), out_f32.shape
    err_f32 = float(jnp.max(jnp.abs(out_f32 - ref)))
    assert jnp.allclose(out_f32, ref, atol=1e-4, rtol=1e-4), f"f32 max_err={err_f32}"

    # performance default (bf16 MXU operands) -> looser tolerance per review
    out_bf16 = jax.block_until_ready(
        render_point_cloud(points, azimuth, elevation, img_size))
    err_bf16 = float(jnp.max(jnp.abs(out_bf16 - ref)))
    assert jnp.allclose(out_bf16, ref, atol=5e-2, rtol=5e-2), f"bf16 max_err={err_bf16}"

    # exercise the row-block parallel fallback (B // BT < 2 -> 2 "parallel" row blocks for v7x)
    out_b1 = jax.block_until_ready(
        render_point_cloud(points[:1], azimuth[:1], elevation[:1], img_size, use_bf16=False))
    ref_b1 = reference_render(points[:1], azimuth[:1], elevation[:1], img_size)
    err_b1 = float(jnp.max(jnp.abs(out_b1 - ref_b1)))
    assert jnp.allclose(out_b1, ref_b1, atol=1e-4, rtol=1e-4), f"b1 max_err={err_b1}"

    print("KERNEL_OK")
</pallas_src>

<mosaic_0001>
module attributes {stable_mosaic.version = 11 : i64} {
  func.func @_splat_kernel(%arg0: i32, %arg1: i32, %arg2: i32, %arg3: memref<1x2x256xf32, #tpu.memory_space<vmem>>, %arg4: memref<1x256x1xf32, #tpu.memory_space<vmem>>, %arg5: memref<1x64x128xf32, #tpu.memory_space<vmem>>) attributes {dimension_semantics = [#tpu.dimension_semantics<parallel>, #tpu.dimension_semantics<parallel>, #tpu.dimension_semantics<arbitrary>], iteration_bounds = array<i64: 2, 1, 1>, scalar_prefetch = 0 : i64, scratch_operands = 0 : i64, tpu.core_type = #tpu.core_type<tc>, window_params = [{transform_indices = @transform_0, window_bounds = array<i64: 1, 2, 256>}, {transform_indices = @transform_1, window_bounds = array<i64: 1, 256, 1>}, {transform_indices = @transform_2, window_bounds = array<i64: 1, 64, 128>}]} {
    %c0_i32 = arith.constant 0 : i32
    %0 = arith.cmpi eq, %arg2, %c0_i32 : i32
    %1 = arith.extui %0 : i1 to i32
    %c0_i32_0 = arith.constant 0 : i32
    %2 = arith.cmpi ne, %1, %c0_i32_0 : i32
    scf.if %2 {
      %cst_16 = arith.constant 0.000000e+00 : f32
      %41 = vector.broadcast %cst_16 : f32 to vector<1x64x128xf32>
      %c0_17 = arith.constant 0 : index
      %c0_18 = arith.constant 0 : index
      %c0_19 = arith.constant 0 : index
      %42 = vector.load %arg5[%c0_17, %c0_18, %c0_19] : memref<1x64x128xf32, #tpu.memory_space<vmem>>, vector<1x64x128xf32>
      tpu.vector_store %arg5[%c0_17, %c0_18, %c0_19], %41 {strides = array<i32>} : memref<1x64x128xf32, #tpu.memory_space<vmem>>, vector<1x64x128xf32>,
    } else {
    }
    %c64_i32 = arith.constant 64 : i32
    %3 = arith.muli %arg1, %c64_i32 : i32
    %4 = tpu.iota {dimensions = array<i32: 0>} : vector<64x1xi32>
    %5 = vector.broadcast %3 : i32 to vector<64x1xi32>
    %6 = arith.addi %5, %4 : vector<64x1xi32>
    %7 = arith.sitofp %6 : vector<64x1xi32> to vector<64x1xf32>
    %8 = tpu.iota {dimensions = array<i32: 1>} : vector<1x128xi32>
    %9 = arith.sitofp %8 : vector<1x128xi32> to vector<1x128xf32>
    %c0 = arith.constant 0 : index
    %c0_1 = arith.constant 0 : index
    %c0_2 = arith.constant 0 : index
    %10 = vector.load %arg3[%c0, %c0_1, %c0_2] : memref<1x2x256xf32, #tpu.memory_space<vmem>>, vector<1x2x256xf32>
    %11 = vector.shape_cast %10 : vector<1x2x256xf32> to vector<2x256xf32>
    %12 = vector.extract_strided_slice %11 {offsets = [0, 0], sizes = [1, 256], strides = [1, 1]} : vector<2x256xf32> to vector<1x256xf32>
    %13 = vector.extract_strided_slice %11 {offsets = [1, 0], sizes = [1, 256], strides = [1, 1]} : vector<2x256xf32> to vector<1x256xf32>
    %14 = vector.broadcast %7 : vector<64x1xf32> to vector<64x256xf32>
    %15 = vector.broadcast %12 : vector<1x256xf32> to vector<64x256xf32>
    %16 = arith.subf %14, %15 : vector<64x256xf32>
    %17 = math.absf %16 : vector<64x256xf32>
    %cst = arith.constant 1.000000e+00 : f32
    %18 = vector.broadcast %cst : f32 to vector<64x256xf32>
    %19 = arith.subf %18, %17 : vector<64x256xf32>
    %cst_3 = arith.constant 0.000000e+00 : f32
    %20 = vector.broadcast %cst_3 : f32 to vector<64x256xf32>
    %21 = arith.maximumf %20, %19 : vector<64x256xf32>
    %22 = vector.broadcast %13 : vector<1x256xf32> to vector<64x256xf32>
    %23 = arith.mulf %21, %22 : vector<64x256xf32>
    %c0_4 = arith.constant 0 : index
    %c0_5 = arith.constant 0 : index
    %c0_6 = arith.constant 0 : index
    %24 = vector.load %arg4[%c0_4, %c0_5, %c0_6] : memref<1x256x1xf32, #tpu.memory_space<vmem>>, vector<1x256x1xf32>
    %25 = vector.shape_cast %24 : vector<1x256x1xf32> to vector<256x1xf32>
    %26 = vector.broadcast %9 : vector<1x128xf32> to vector<256x128xf32>
    %27 = vector.broadcast %25 : vector<256x1xf32> to vector<256x128xf32>
    %28 = arith.subf %26, %27 : vector<256x128xf32>
    %29 = math.absf %28 : vector<256x128xf32>
    %cst_7 = arith.constant 1.000000e+00 : f32
    %30 = vector.broadcast %cst_7 : f32 to vector<256x128xf32>
    %31 = arith.subf %30, %29 : vector<256x128xf32>
    %cst_8 = arith.constant 0.000000e+00 : f32
    %32 = vector.broadcast %cst_8 : f32 to vector<256x128xf32>
    %33 = arith.maximumf %32, %31 : vector<256x128xf32>
    %c0_9 = arith.constant 0 : index
    %c0_10 = arith.constant 0 : index
    %c0_11 = arith.constant 0 : index
    %34 = vector.load %arg5[%c0_9, %c0_10, %c0_11] : memref<1x64x128xf32, #tpu.memory_space<vmem>>, vector<1x64x128xf32>
    %35 = vector.shape_cast %34 : vector<1x64x128xf32> to vector<64x128xf32>
    %cst_12 = arith.constant dense<0.000000e+00> : vector<64x128xf32>
    %36 = tpu.matmul %23, %33, %cst_12 {dimension_numbers = #tpu.dot_dimension_numbers<[1], [0], [0], [1], [0, 0, 1, 1], [], []>} : vector<64x256xf32>, vector<256x128xf32>, vector<64x128xf32> -> vector<64x128xf32>
    %37 = arith.addf %35, %36 : vector<64x128xf32>
    %c0_13 = arith.constant 0 : index
    %c0_14 = arith.constant 0 : index
    %c0_15 = arith.constant 0 : index
    %38 = vector.load %arg5[%c0_13, %c0_14, %c0_15] : memref<1x64x128xf32, #tpu.memory_space<vmem>>, vector<1x64x128xf32>
    %39 = vector.shape_cast %38 : vector<1x64x128xf32> to vector<64x128xf32>
    %40 = vector.shape_cast %37 : vector<64x128xf32> to vector<1x64x128xf32>
    tpu.vector_store %arg5[%c0_13, %c0_14, %c0_15], %40 {strides = array<i32>} : memref<1x64x128xf32, #tpu.memory_space<vmem>>, vector<1x64x128xf32>,
    return
  }
  func.func @transform_0(%arg0: i32, %arg1: i32, %arg2: i32) -> (i32, i32, i32) {
    %c0_i32 = arith.constant 0 : i32
    %c0_i32_0 = arith.constant 0 : i32
    return %arg0, %c0_i32, %arg2 : i32, i32, i32
  }
  func.func @transform_1(%arg0: i32, %arg1: i32, %arg2: i32) -> (i32, i32, i32) {
    %c0_i32 = arith.constant 0 : i32
    %c0_i32_0 = arith.constant 0 : i32
    return %arg0, %arg2, %c0_i32 : i32, i32, i32
  }
  func.func @transform_2(%arg0: i32, %arg1: i32, %arg2: i32) -> (i32, i32, i32) {
    %c0_i32 = arith.constant 0 : i32
    %c0_i32_0 = arith.constant 0 : i32
    return %arg0, %arg1, %c0_i32 : i32, i32, i32
  }
}

</mosaic_0001>

<bundles_post_ra>
// kernel: tpu_custom_call.1
= control target key start
LH: loop header
LB: loop body
LE: loop exit
PB: predicated region body
PF: predicated region fallthrough
CT: control target
= control target key end

     0   :  { %7 = vsyncpa [#allocation3], 0  ;;  %s1496_s0 = inlined_call_operand.vmem [shape: f32[2,2,256], index: 0, kind: input, shape index: {}]   ;;  %s1497_s1 = inlined_call_operand.vmem [shape: f32[2,256,1], index: 1, kind: input, shape index: {}]   ;;  %s1498_s2 = inlined_call_operand.hbm [shape: f32[2,64,128], index: 2, kind: output, shape index: {}]  }
   0x1   :  { %9 = vsyncpa [#allocation3 + $0x1], 0  ;;  %s1205_s9 = smov 0   ;;  %s1207_s10 = smov 0  }
   0x2   :  { %s1209_s11 = smov 0   ;;  %s1211_s12 = smov 0  }
   0x3   :  { %s1213_s13 = smov 0   ;;  %s1215_s14 = smov 0  }
   0x4 LB: > { %s941_s15 = sadd.s32 4294967295, %s1184_s14   ;;  %s942_s16 = sadd.s32 4294967294, %s1184_s14   ;;  %s1184_s14 = sphi %s1215_s14, %s15_s14   ;;  %s1180_s13 = sphi %s1213_s13, %s1505_s13   ;;  %s1176_s12 = sphi %s1211_s12, %s1504_s12   ;;  %s1172_s11 = sphi %s1209_s11, %s1503_s11   ;;  %s1168_s10 = sphi %s1207_s10, %s1502_s10   ;;  %s1164_s9 = sphi %s1205_s9, %s1501_s9  }
   0x5   : > { %s34_s17 = sadd.s32 1, %s1180_s13  ;;  %s99_s18 = sadd.s32 1, %s1172_s11 }
   0x6   : > { %p36_p0 = scmp.ge.s32.totalorder %s34_s17, 2  ;;  %p109_p1 = scmp.ne.s32.totalorder %s1172_s11, %s1168_s10 }
   0x7   : > { %p110_p2 = scmp.eq.s32.totalorder %s941_s15, 1  ;;  %p115_p3 = scmp.ne.s32.totalorder %s1168_s10, %s1164_s9 }
   0x8   : > { %s1507_s17 = smov (%p36_p0, %s34_s17), 0  ;;  %p116_p5 = scmp.eq.s32.totalorder %s942_s16, 1 }
   0x9   : > { %p1245_p4 = por %p110_p2, %p109_p1  ;;  %s94_s20 = ssub.s32 %s1180_s13, %s1507_s17 }
   0xa   : > { %p945_p6 = scmp.ge.s32.totalorder %s1184_s14, 1  ;;  %p97_p7 = scmp.eq.s32.totalorder %s94_s20, 0 }
   0xb   : > { %p1252_p8 = por %p116_p5, %p115_p3  ;;  %p160_p9 = scmp.lt.s32.totalorder %s1184_s14, 3 }
   0xc   : > { %s1258_s22 = scalar_select %p97_p7, %s1172_s11, %s99_s18  }
   0xd   : > { %p161_p10 = pnand %p945_p6, %p160_p9 }
   0xe   : > { %p196_p11 = scmp.lt.s32.totalorder (!%p161_p10), %s1176_s12, 1  ;;  %s192_s4 = sand.u32 (!%p161_p10), 1, %s1168_s10  }
   0xf   : > { %164 = sbr.rel (%p161_p10) target bundleno = 442 (0x1ba), region = 28  ;;  %s946_s5 = sshll.u32 (!%p161_p10), %s192_s4, 6 }
  0x10   : > { %s194_s6 = scalar_lea.vmem (!%p161_p10), [#allocation2], %s946_s5  ;;  %s958_s7 = sshll.u32 (!%p161_p10), %s1176_s12, 10 }
  0x11   : > { %s841_s8 = sshll.u32 (!%p161_p10), %s194_s6, 4  ;;  %s1445_s18 = scalar_lea.hbm (!%p161_p10), %s1498_s2, %s958_s7  ;;  %s1447_s8 = int_to_ptr.vmem [resolvable:$true] %s841_s8 }
  0x12   : > { %s1108_s20 = scalar_lea.vmem (!%p161_p10), %s1447_s8, 1024 }
  0x13   : > { %p1109_p12 = scmp.ne.s32.totalorder (!%p161_p10), %s1447_s8, %s1108_s20 }
  0x14   : > { %v1186_v0 = vmov 0   ;;  %s1262_s23 = scalar_select %p196_p11, %s1176_s12, 1  ;;  %v229_v27 = vlaneseq }
  0x15   : > { %1107 = vset.pattern.permute.xlu1 %v1186_v0  ;;  %1106 = vset.pattern.permute.xlu0 %v1186_v0  ;;  %s1451_s12 = scalar_lea.sflag [#allocation3], %s192_s4  ;;  %p1110_p13 = pnand %p1109_p12, %p1245_p4 }
  0x16   : > { %s957_s24 = sshll.u32 %s1262_s23, 8  ;;  %v1297_v28 = vshrl.u32 %v229_v27, 7  ;;  %s956_s28 = sshll.u32 %s1262_s23, 2 }
  0x17   : > { %s1268_s27 = scalar_lea.vmem %s1497_s1, %s957_s24  ;;  %s203_s3 = scalar_lea.vmem %s1496_s0, %s956_s28 }
  0x18   : > { %v407_v1 = vld [vmem:[%s1268_s27 + $0xf8] sm:$0xff]  ;;  %v406_v2 = vld [vmem:[%s1268_s27 + $0xf0] sm:$0xff]  ;;  %v405_v5 = vld [vmem:[%s1268_s27 + $0xe8] sm:$0xff]  ;;  %v266_v31 = vsub.s32 2, %v1297_v28  ;;  %v262_v33 = vsub.s32 0, %v1297_v28  ;;  %v234_v35 = vadd.s32 32, %v1297_v28  ;;  %v247_v39 = vcvt.s32.f32 %v1297_v28  ;;  %p1111_p0 = pneg %p1110_p13 }
  0x19   : > { %565 = vperm.xlu0 %1106, %v407_v1   ;;  %560 = vperm.xlu1 %1107, %v406_v2   ;;  %v391_v3 = vld [vmem:[%s1268_s27 + $0x78] sm:$0xff]  ;;  %v390_v4 = vld [vmem:[%s1268_s27 + $0x70] sm:$0xff]  ;;  %v389_v6 = vld [vmem:[%s1268_s27 + $0x68] sm:$0xff]  ;;  %v231_v45 = vadd.s32 8, %v1297_v28  ;;  %v235_v46 = vadd.s32 40, %v1297_v28  ;;  %v348_v52 = vsub.s32 3, %v1297_v28 }
  0x1a   : > { %v404_v7 = vld [vmem:[%s1268_s27 + $0xe0] sm:$0xff]  ;;  %v403_v9 = vld [vmem:[%s1268_s27 + $0xd8] sm:$0xff]  ;;  %v402_v11 = vld [vmem:[%s1268_s27 + $0xd0] sm:$0xff]  ;;  %v251_v41 = vcvt.s32.f32 %v234_v35  ;;  %v344_v55 = vsub.s32 1, %v1297_v28  ;;  %s1187_s23 = smov [#allocation2]  }
  0x1b   : > { %v388_v8 = vld [vmem:[%s1268_s27 + $0x60] sm:$0xff]  ;;  %v387_v10 = vld [vmem:[%s1268_s27 + $0x58] sm:$0xff]  ;;  %v386_v12 = vld [vmem:[%s1268_s27 + $0x50] sm:$0xff]  ;;  %v248_v54 = vcvt.s32.f32 %v231_v45  ;;  %v252_v58 = vcvt.s32.f32 %v235_v46  ;;  %s1112_s24 = sshll.u32 %s1187_s23, 4  ;;  %s1113_s24 = int_to_ptr.vmem [resolvable:$false] %s1112_s24 }
  0x1c   : > { %v401_v13 = vld [vmem:[%s1268_s27 + $0xc8] sm:$0xff]  ;;  %v400_v15 = vld [vmem:[%s1268_s27 + $0xc0] sm:$0xff]  ;;  %v399_v17 = vld [vmem:[%s1268_s27 + $0xb8] sm:$0xff]  ;;  %s1114_s25 = scalar_lea.vmem %s1113_s24, 2048  ;;  %p1115_p1 = scmp.lt.s32.totalorder %s1447_s8, %s1113_s24 }
  0x1d   : > { %485 = vperm.xlu0 %1106, %v391_v3   ;;  %480 = vperm.xlu1 %1107, %v390_v4   ;;  %v385_v14 = vld [vmem:[%s1268_s27 + $0x48] sm:$0xff]  ;;  %v384_v16 = vld [vmem:[%s1268_s27 + $0x40] sm:$0xff]  ;;  %v383_v18 = vld [vmem:[%s1268_s27 + $0x38] sm:$0xff]  ;;  %p1116_p2 = scmp.lt.s32.totalorder %s1114_s25, %s1108_s20 }
  0x1e   : > { %v398_v19 = vld [vmem:[%s1268_s27 + $0xb0] sm:$0xff]  ;;  %v397_v21 = vld [vmem:[%s1268_s27 + $0xa8] sm:$0xff]  ;;  %v396_v23 = vld [vmem:[%s1268_s27 + $0xa0] sm:$0xff] }
  0x1f   : > { %v382_v20 = vld [vmem:[%s1268_s27 + $0x30] sm:$0xff]  ;;  %v381_v22 = vld [vmem:[%s1268_s27 + $0x28] sm:$0xff]  ;;  %v380_v24 = vld [vmem:[%s1268_s27 + $0x20] sm:$0xff]  ;;  %p1117_p3 = por %p1116_p2, %p1115_p1 }
  0x20   : > { %v395_v25 = vld [vmem:[%s1268_s27 + $0x98] sm:$0xff]  ;;  %v394_v29 = vld [vmem:[%s1268_s27 + $0x90] sm:$0xff]  ;;  %v258_v32 = vld [vmem:[%s203_s3] sm:$0xf] }
  0x21   : > { %555 = vperm.xlu0 %1106, %v405_v5   ;;  %475 = vperm.xlu1 %1107, %v389_v6   ;;  %v379_v26 = vld [vmem:[%s1268_s27 + $0x18] sm:$0xff]  ;;  %v378_v30 = vld [vmem:[%s1268_s27 + $0x10] sm:$0xff]  ;;  %v267_v34 = vrot.slane %v258_v32, %v266_v31  ;;  %v263_v36 = vrot.slane %v258_v32, %v262_v33  ;;  %v393_v37 = vld [vmem:[%s1268_s27 + $0x88] sm:$0xff]  ;;  %v349_v60 = vrot.slane %v258_v32, %v348_v52  ;;  %p1118_p5 = pnand %p1117_p3, %p1111_p0 }
  0x22   : > { %v377_v38 = vld [vmem:[%s1268_s27 + $0x8] sm:$0xff]  ;;  %v392_v47 = vld [vmem:[%s1268_s27 + $0x80] sm:$0xff]  ;;  %v345_v0 = vrot.slane %v258_v32, %v344_v55 }
  0x23   : > { %v1311_v40 = vrot.slane %v267_v34, %v262_v33  ;;  %v1313_v42 = vrot.slane %v263_v36, %v262_v33  ;;  %v376_v50 = vld [vmem:[%s1268_s27] sm:$0xff]  ;;  %v1327_v4 = vrot.slane %v349_v60, %v344_v55 }
  0x25   : > { %550 = vperm.xlu0 %1106, %v404_v7   ;;  %470 = vperm.xlu1 %1107, %v388_v8   ;;  %v279_v43 = vsub.f32 %v247_v39, %v1311_v40  ;;  %v287_v44 = vsub.f32 %v251_v41, %v1311_v40  ;;  %v278_v48 = vsub.f32 %v247_v39, %v1313_v42 }
  0x26   : > { %v286_v49 = vsub.f32 %v251_v41, %v1313_v42  ;;  %v281_v62 = vsub.f32 %v248_v54, %v1311_v40  ;;  %v289_v2 = vsub.f32 %v252_v58, %v1311_v40  ;;  %v1329_v8 = vrot.slane %v345_v0, %v344_v55 }
  0x27   : > { %v295_v51 = vand.u32 2147483647, %v279_v43  ;;  %v303_v53 = vand.u32 2147483647, %v287_v44  ;;  %v294_v56 = vand.u32 2147483647, %v278_v48 }
  0x28   : > { %v302_v57 = vand.u32 2147483647, %v286_v49  ;;  %v297_v6 = vand.u32 2147483647, %v281_v62 }
  0x29   : > { %545 = vperm.xlu0 %1106, %v403_v9   ;;  %465 = vperm.xlu1 %1107, %v387_v10   ;;  %v311_v59 = vsub.f32 1.0, %v295_v51  ;;  %v319_v61 = vsub.f32 1.0, %v303_v53  ;;  %v310_v63 = vsub.f32 1.0, %v294_v56  ;;  %v305_v10 = vand.u32 2147483647, %v289_v2 }
  0x2a   : > { %v318_v1 = vsub.f32 1.0, %v302_v57 }
  0x2b   : > { %v327_v3 = vmax.f32 %v311_v59, 0.0  ;;  %v335_v5 = vmax.f32 %v319_v61, 0.0  ;;  %v326_v7 = vmax.f32 %v310_v63, 0.0 }
  0x2c   : > { %v334_v9 = vmax.f32 %v318_v1, 0.0 }
  0x2d   : > { %540 = vperm.xlu0 %1106, %v402_v11   ;;  %460 = vperm.xlu1 %1107, %v386_v12   ;;  %v361_v11 = vmul.f32 %v1327_v4, %v327_v3  ;;  %v369_v12 = vmul.f32 %v1327_v4, %v335_v5 }
  0x2f   : > { %768 = vmatprep.mubr.f32.mxu0 %v361_v11  ;;  %788 = vmatprep.mubr.f32.mxu1 %v369_v12 }
  0x31   : > { %535 = vperm.xlu0 %1106, %v401_v13   ;;  %455 = vperm.xlu1 %1107, %v385_v14   ;;  %v313_v13 = vsub.f32 1.0, %v297_v6  ;;  %v280_v14 = vsub.f32 %v248_v54, %v1313_v42 }
  0x35   : > { %530 = vperm.xlu0 %1106, %v400_v15   ;;  %450 = vperm.xlu1 %1107, %v384_v16   ;;  %v1335_v15 = vmul.f32 %v1329_v8, %v326_v7  ;;  %v1338_v16 = vmul.f32 %v1329_v8, %v334_v9 }
  0x39   : > { %525 = vperm.xlu0 %1106, %v399_v17   ;;  %445 = vperm.xlu1 %1107, %v383_v18   ;;  %v321_v17 = vsub.f32 1.0, %v305_v10  ;;  %v288_v18 = vsub.f32 %v252_v58, %v1313_v42 }
  0x3d   : > { %520 = vperm.xlu0 %1106, %v398_v19   ;;  %440 = vperm.xlu1 %1107, %v382_v20   ;;  %v329_v19 = vmax.f32 %v313_v13, 0.0  ;;  %v296_v20 = vand.u32 2147483647, %v280_v14 }
  0x41   : > { %515 = vperm.xlu0 %1106, %v397_v21   ;;  %435 = vperm.xlu1 %1107, %v381_v22   ;;  %v232_v21 = vadd.s32 16, %v1297_v28  ;;  %v236_v22 = vadd.s32 48, %v1297_v28 }
  0x43   : > { %v249_v31 = vcvt.s32.f32 %v232_v21  ;;  %v253_v32 = vcvt.s32.f32 %v236_v22 }
  0x45   : > { %510 = vperm.xlu0 %1106, %v396_v23   ;;  %430 = vperm.xlu1 %1107, %v380_v24   ;;  %v337_v23 = vmax.f32 %v321_v17, 0.0  ;;  %v304_v24 = vand.u32 2147483647, %v288_v18  ;;  %v291_v39 = vsub.f32 %v253_v32, %v1311_v40  ;;  %v282_v41 = vsub.f32 %v249_v31, %v1313_v42 }
  0x46   : > { %v290_v43 = vsub.f32 %v253_v32, %v1313_v42 }
  0x47   : > { %v1349_v33 = vmul.f32 %v1327_v4, %v337_v23  ;;  %v320_v34 = vsub.f32 1.0, %v304_v24  ;;  %v307_v48 = vand.u32 2147483647, %v291_v39  ;;  %v298_v49 = vand.u32 2147483647, %v282_v41 }
  0x48   : > { %v306_v51 = vand.u32 2147483647, %v290_v43 }
  0x49   : > { %505 = vperm.xlu0 %1106, %v395_v25   ;;  %425 = vperm.xlu1 %1107, %v379_v26   ;;  %v233_v25 = vadd.s32 24, %v1297_v28  ;;  %v237_v26 = vadd.s32 56, %v1297_v28  ;;  %v336_v28 = vmax.f32 %v320_v34, 0.0  ;;  %v323_v55 = vsub.f32 1.0, %v307_v48 }
  0x4a   : > { %v314_v56 = vsub.f32 1.0, %v298_v49  ;;  %v322_v58 = vsub.f32 1.0, %v306_v51 }
  0x4b   : > { %v250_v35 = vcvt.s32.f32 %v233_v25  ;;  %v254_v36 = vcvt.s32.f32 %v237_v26  ;;  %v339_v62 = vmax.f32 %v323_v55, 0.0 }
  0x4c   : > { %v330_v63 = vmax.f32 %v314_v56, 0.0  ;;  %v338_v1 = vmax.f32 %v322_v58, 0.0 }
  0x4d   : > { %500 = vperm.xlu0 %1106, %v394_v29   ;;  %420 = vperm.xlu1 %1107, %v378_v30   ;;  %v1346_v29 = vmul.f32 %v1327_v4, %v329_v19  ;;  %v312_v30 = vsub.f32 1.0, %v296_v20  ;;  %v285_v44 = vsub.f32 %v250_v35, %v1311_v40  ;;  %v293_v45 = vsub.f32 %v254_v36, %v1311_v40 }
  0x4e   : > { %v284_v57 = vsub.f32 %v250_v35, %v1313_v42  ;;  %v292_v60 = vsub.f32 %v254_v36, %v1313_v42  ;;  %v1369_v7 = vmul.f32 %v1327_v4, %v339_v62  ;;  %v1372_v9 = vmul.f32 %v1329_v8, %v330_v63 }
  0x4f   : > { %v301_v52 = vand.u32 2147483647, %v285_v44  ;;  %v309_v53 = vand.u32 2147483647, %v293_v45  ;;  %v1375_v42 = vmul.f32 %v1329_v8, %v338_v1  ;;  %v256_v20 = vand.u32 127, %v229_v27 }
  0x50   : > { %v300_v0 = vand.u32 2147483647, %v284_v57  ;;  %v308_v5 = vand.u32 2147483647, %v292_v60 }
  0x51   : > { %495 = vperm.xlu0 %1106, %v393_v37   ;;  %415 = vperm.xlu1 %1107, %v377_v38   ;;  %v328_v37 = vmax.f32 %v312_v30, 0.0  ;;  %v283_v38 = vsub.f32 %v249_v31, %v1311_v40  ;;  %v317_v59 = vsub.f32 1.0, %v301_v52  ;;  %v325_v40 = vsub.f32 1.0, %v309_v53 }
  0x52   : > { %v316_v10 = vsub.f32 1.0, %v300_v0  ;;  %v324_v13 = vsub.f32 1.0, %v308_v5  ;;  %v1390_v21 = vcvt.s32.f32 %v256_v20 }
  0x53   : > { %v1358_v46 = vmul.f32 %v1329_v8, %v328_v37  ;;  %v333_v2 = vmax.f32 %v317_v59, 0.0  ;;  %v341_v3 = vmax.f32 %v325_v40, 0.0 }
  0x54   : > { %v332_v14 = vmax.f32 %v316_v10, 0.0  ;;  %v340_v17 = vmax.f32 %v324_v13, 0.0 }
  0x55   : > { %490 = vperm.xlu0 %1106, %v392_v47   ;;  %410 = vperm.xlu1 %1107, %v376_v50   ;;  %v299_v47 = vand.u32 2147483647, %v283_v38  ;;  %v1361_v50 = vmul.f32 %v1329_v8, %v336_v28  ;;  %v1378_v11 = vmul.f32 %v1327_v4, %v333_v2  ;;  %v1381_v12 = vmul.f32 %v1327_v4, %v341_v3 }
  0x56   : > { %v1384_v18 = vmul.f32 %v1329_v8, %v332_v14  ;;  %v1387_v19 = vmul.f32 %v1329_v8, %v340_v17 }
  0x57   : > { %v315_v54 = vsub.f32 1.0, %v299_v47 }
  0x59   : > { %v331_v61 = vmax.f32 %v315_v54, 0.0 }
  0x5b   : > { %v1366_v6 = vmul.f32 %v1327_v4, %v331_v61 }
  0x94   : > { %v566_v22 = vpop.permute.xlu0 %565  ;;  %v561_v23 = vpop.permute.xlu1 %560 }
  0x95   : > { %v599_v24 = vsub.f32 %v1390_v21, %v566_v22  ;;  %v598_v4 = vsub.f32 %v1390_v21, %v561_v23 }
  0x97   : > { %v631_v25 = vand.u32 2147483647, %v599_v24  ;;  %v630_v26 = vand.u32 2147483647, %v598_v4 }
  0x98   : > { %v486_v30 = vpop.permute.xlu0 %485  ;;  %v481_v31 = vpop.permute.xlu1 %480 }
  0x99   : > { %v663_v32 = vsub.f32 1.0, %v631_v25  ;;  %v583_v34 = vsub.f32 %v1390_v21, %v486_v30  ;;  %v582_v8 = vsub.f32 %v1390_v21, %v481_v31  ;;  %v662_v37 = vsub.f32 1.0, %v630_v26 }
  0x9b   : > { %v615_v35 = vand.u32 2147483647, %v583_v34  ;;  %v614_v36 = vand.u32 2147483647, %v582_v8  ;;  %v695_v27 = vmax.f32 %v663_v32, 0.0  ;;  %v694_v49 = vmax.f32 %v662_v37, 0.0 }
  0x9c   : > { %v556_v38 = vpop.permute.xlu0 %555  ;;  %v476_v39 = vpop.permute.xlu1 %475 }
  0x9d   : > { %v647_v41 = vsub.f32 1.0, %v615_v35  ;;  %v646_v28 = vsub.f32 1.0, %v614_v36  ;;  %v597_v43 = vsub.f32 %v1390_v21, %v556_v38  ;;  %v581_v44 = vsub.f32 %v1390_v21, %v476_v39  ;;  %959 = vmatprep.subr.mxu0 %v695_v27  ;;  %1015 = vmatprep.subr.mxu1 %v695_v27 }
  0x9f   : > { %v629_v45 = vand.u32 2147483647, %v597_v43  ;;  %v613_v47 = vand.u32 2147483647, %v581_v44  ;;  %v679_v48 = vmax.f32 %v647_v41, 0.0  ;;  %v678_v51 = vmax.f32 %v646_v28, 0.0 }
  0xa0   : > { %v551_v52 = vpop.permute.xlu0 %550  ;;  %v471_v53 = vpop.permute.xlu1 %470 }
  0xa1   : > { %v661_v54 = vsub.f32 1.0, %v629_v45  ;;  %v645_v55 = vsub.f32 1.0, %v613_v47  ;;  %v596_v56 = vsub.f32 %v1390_v21, %v551_v52  ;;  %v580_v57 = vsub.f32 %v1390_v21, %v471_v53  ;;  %960 = vmatpush3.msra.mxu0 %v679_v48  ;;  %1031 = vmatpush3.msra.mxu1 %v679_v48 }
  0xa2   : > { %961 = vmatprep.subr.mxu0 %v694_v49  ;;  %1016 = vmatprep.subr.mxu1 %v694_v49 }
  0xa3   : > { %v693_v58 = vmax.f32 %v661_v54, 0.0  ;;  %v677_v59 = vmax.f32 %v645_v55, 0.0  ;;  %v628_v40 = vand.u32 2147483647, %v596_v56  ;;  %v612_v60 = vand.u32 2147483647, %v580_v57  ;;  %962 = vmatpush3.msra.mxu0 %v678_v51  ;;  %1032 = vmatpush3.msra.mxu1 %v678_v51 }
  0xa4   : > { %v546_v61 = vpop.permute.xlu0 %545  ;;  %v466_v62 = vpop.permute.xlu1 %465 }
  0xa5   : > { %v660_v63 = vsub.f32 1.0, %v628_v40  ;;  %v644_v0 = vsub.f32 1.0, %v612_v60  ;;  %v595_v1 = vsub.f32 %v1390_v21, %v546_v61  ;;  %v579_v2 = vsub.f32 %v1390_v21, %v466_v62  ;;  %963 = vmatprep.subr.mxu0 %v693_v58  ;;  %1017 = vmatprep.subr.mxu1 %v693_v58 }
  0xa6   : > { %964 = vmatpush3.msra.mxu0 %v677_v59  ;;  %1033 = vmatpush3.msra.mxu1 %v677_v59 }
  0xa7   : > { %v692_v3 = vmax.f32 %v660_v63, 0.0  ;;  %v676_v5 = vmax.f32 %v644_v0, 0.0  ;;  %v627_v10 = vand.u32 2147483647, %v595_v1  ;;  %v611_v13 = vand.u32 2147483647, %v579_v2 }
  0xa8   : > { %v541_v14 = vpop.permute.xlu0 %540  ;;  %v461_v17 = vpop.permute.xlu1 %460 }
  0xa9   : > { %v659_v20 = vsub.f32 1.0, %v627_v10  ;;  %v643_v22 = vsub.f32 1.0, %v611_v13  ;;  %v594_v23 = vsub.f32 %v1390_v21, %v541_v14  ;;  %v578_v24 = vsub.f32 %v1390_v21, %v461_v17  ;;  %965 = vmatprep.subr.mxu0 %v692_v3  ;;  %1018 = vmatprep.subr.mxu1 %v692_v3 }
  0xaa   : > { %966 = vmatpush3.msra.mxu0 %v676_v5  ;;  %1034 = vmatpush3.msra.mxu1 %v676_v5 }
  0xab   : > { %v691_v4 = vmax.f32 %v659_v20, 0.0  ;;  %v675_v25 = vmax.f32 %v643_v22, 0.0  ;;  %v626_v26 = vand.u32 2147483647, %v594_v23  ;;  %v610_v30 = vand.u32 2147483647, %v578_v24 }
  0xac   : > { %v536_v31 = vpop.permute.xlu0 %535  ;;  %v456_v32 = vpop.permute.xlu1 %455 }
  0xad   : > { %v658_v34 = vsub.f32 1.0, %v626_v26  ;;  %v642_v8 = vsub.f32 1.0, %v610_v30  ;;  %v593_v35 = vsub.f32 %v1390_v21, %v536_v31  ;;  %v577_v36 = vsub.f32 %v1390_v21, %v456_v32  ;;  %967 = vmatprep.subr.mxu0 %v691_v4  ;;  %1019 = vmatprep.subr.mxu1 %v691_v4 }
  0xae   : > { %968 = vmatpush3.msra.mxu0 %v675_v25  ;;  %1035 = vmatpush3.msra.mxu1 %v675_v25 }
  0xaf   : > { %v690_v27 = vmax.f32 %v658_v34, 0.0  ;;  %v674_v37 = vmax.f32 %v642_v8, 0.0  ;;  %v625_v38 = vand.u32 2147483647, %v593_v35  ;;  %v609_v39 = vand.u32 2147483647, %v577_v36 }
  0xb0   : > { %v531_v41 = vpop.permute.xlu0 %530  ;;  %v451_v28 = vpop.permute.xlu1 %450 }
  0xb1   : > { %v657_v43 = vsub.f32 1.0, %v625_v38  ;;  %v641_v44 = vsub.f32 1.0, %v609_v39  ;;  %v592_v45 = vsub.f32 %v1390_v21, %v531_v41  ;;  %v576_v47 = vsub.f32 %v1390_v21, %v451_v28  ;;  %969 = vmatprep.subr.mxu0 %v690_v27  ;;  %1020 = vmatprep.subr.mxu1 %v690_v27 }
  0xb2   : > { %970 = vmatpush3.msra.mxu0 %v674_v37  ;;  %1036 = vmatpush3.msra.mxu1 %v674_v37 }
  0xb3   : > { %v689_v48 = vmax.f32 %v657_v43, 0.0  ;;  %v673_v49 = vmax.f32 %v641_v44, 0.0  ;;  %v624_v51 = vand.u32 2147483647, %v592_v45  ;;  %v608_v52 = vand.u32 2147483647, %v576_v47 }
  0xb4   : > { %v526_v53 = vpop.permute.xlu0 %525  ;;  %v446_v54 = vpop.permute.xlu1 %445 }
  0xb5   : > { %v656_v55 = vsub.f32 1.0, %v624_v51  ;;  %v640_v56 = vsub.f32 1.0, %v608_v52  ;;  %v591_v57 = vsub.f32 %v1390_v21, %v526_v53  ;;  %v575_v58 = vsub.f32 %v1390_v21, %v446_v54  ;;  %971 = vmatprep.subr.mxu0 %v689_v48  ;;  %1021 = vmatprep.subr.mxu1 %v689_v48 }
  0xb6   : > { %972 = vmatpush3.msra.mxu0 %v673_v49  ;;  %1037 = vmatpush3.msra.mxu1 %v673_v49 }
  0xb7   : > { %v688_v59 = vmax.f32 %v656_v55, 0.0  ;;  %v672_v40 = vmax.f32 %v640_v56, 0.0  ;;  %v623_v60 = vand.u32 2147483647, %v591_v57  ;;  %v607_v61 = vand.u32 2147483647, %v575_v58 }
  0xb8   : > { %v521_v62 = vpop.permute.xlu0 %520  ;;  %v441_v63 = vpop.permute.xlu1 %440 }
  0xb9   : > { %v655_v0 = vsub.f32 1.0, %v623_v60  ;;  %v639_v1 = vsub.f32 1.0, %v607_v61  ;;  %v590_v2 = vsub.f32 %v1390_v21, %v521_v62  ;;  %v574_v3 = vsub.f32 %v1390_v21, %v441_v63  ;;  %973 = vmatprep.subr.mxu0 %v688_v59  ;;  %1022 = vmatprep.subr.mxu1 %v688_v59 }
  0xba   : > { %974 = vmatpush3.msra.mxu0 %v672_v40  ;;  %1038 = vmatpush3.msra.mxu1 %v672_v40 }
  0xbb   : > { %v687_v5 = vmax.f32 %v655_v0, 0.0  ;;  %v671_v10 = vmax.f32 %v639_v1, 0.0  ;;  %v622_v13 = vand.u32 2147483647, %v590_v2  ;;  %v606_v14 = vand.u32 2147483647, %v574_v3 }
  0xbc   : > { %v516_v17 = vpop.permute.xlu0 %515  ;;  %v436_v20 = vpop.permute.xlu1 %435 }
  0xbd   : > { %v654_v22 = vsub.f32 1.0, %v622_v13  ;;  %v638_v23 = vsub.f32 1.0, %v606_v14  ;;  %v589_v24 = vsub.f32 %v1390_v21, %v516_v17  ;;  %v573_v4 = vsub.f32 %v1390_v21, %v436_v20  ;;  %975 = vmatprep.subr.mxu0 %v687_v5  ;;  %1023 = vmatprep.subr.mxu1 %v687_v5 }
  0xbe   : > { %976 = vmatpush3.msra.mxu0 %v671_v10  ;;  %1039 = vmatpush3.msra.mxu1 %v671_v10 }
  0xbf   : > { %v686_v25 = vmax.f32 %v654_v22, 0.0  ;;  %v670_v26 = vmax.f32 %v638_v23, 0.0  ;;  %v621_v30 = vand.u32 2147483647, %v589_v24  ;;  %v605_v31 = vand.u32 2147483647, %v573_v4 }
  0xc0   : > { %v511_v32 = vpop.permute.xlu0 %510  ;;  %v431_v34 = vpop.permute.xlu1 %430 }
  0xc1   : > { %v653_v8 = vsub.f32 1.0, %v621_v30  ;;  %v637_v35 = vsub.f32 1.0, %v605_v31  ;;  %v588_v36 = vsub.f32 %v1390_v21, %v511_v32  ;;  %v572_v27 = vsub.f32 %v1390_v21, %v431_v34  ;;  %977 = vmatprep.subr.mxu0 %v686_v25  ;;  %1024 = vmatprep.subr.mxu1 %v686_v25 }
  0xc2   : > { %978 = vmatpush3.msra.mxu0 %v670_v26  ;;  %1040 = vmatpush3.msra.mxu1 %v670_v26 }
  0xc3   : > { %v685_v37 = vmax.f32 %v653_v8, 0.0  ;;  %v669_v38 = vmax.f32 %v637_v35, 0.0  ;;  %v620_v39 = vand.u32 2147483647, %v588_v36  ;;  %v604_v41 = vand.u32 2147483647, %v572_v27 }
  0xc4   : > { %v506_v28 = vpop.permute.xlu0 %505  ;;  %v426_v43 = vpop.permute.xlu1 %425 }
  0xc5   : > { %v652_v44 = vsub.f32 1.0, %v620_v39  ;;  %v636_v45 = vsub.f32 1.0, %v604_v41  ;;  %v587_v47 = vsub.f32 %v1390_v21, %v506_v28  ;;  %v571_v48 = vsub.f32 %v1390_v21, %v426_v43  ;;  %979 = vmatprep.subr.mxu0 %v685_v37  ;;  %1025 = vmatprep.subr.mxu1 %v685_v37 }
  0xc6   : > { %980 = vmatpush3.msra.mxu0 %v669_v38  ;;  %1041 = vmatpush3.msra.mxu1 %v669_v38 }
  0xc7   : > { %v684_v49 = vmax.f32 %v652_v44, 0.0  ;;  %v668_v51 = vmax.f32 %v636_v45, 0.0  ;;  %v619_v52 = vand.u32 2147483647, %v587_v47  ;;  %v603_v53 = vand.u32 2147483647, %v571_v48 }
  0xc8   : > { %v501_v54 = vpop.permute.xlu0 %500  ;;  %v421_v55 = vpop.permute.xlu1 %420 }
  0xc9   : > { %v651_v56 = vsub.f32 1.0, %v619_v52  ;;  %v635_v57 = vsub.f32 1.0, %v603_v53  ;;  %v586_v58 = vsub.f32 %v1390_v21, %v501_v54  ;;  %v570_v59 = vsub.f32 %v1390_v21, %v421_v55  ;;  %981 = vmatprep.subr.mxu0 %v684_v49  ;;  %1026 = vmatprep.subr.mxu1 %v684_v49 }
  0xca   : > { %982 = vmatpush3.msra.mxu0 %v668_v51  ;;  %1042 = vmatpush3.msra.mxu1 %v668_v51 }
  0xcb   : > { %v683_v40 = vmax.f32 %v651_v56, 0.0  ;;  %v667_v60 = vmax.f32 %v635_v57, 0.0  ;;  %v618_v61 = vand.u32 2147483647, %v586_v58  ;;  %v602_v62 = vand.u32 2147483647, %v570_v59 }
  0xcc   : > { %v496_v63 = vpop.permute.xlu0 %495  ;;  %v416_v0 = vpop.permute.xlu1 %415 }
  0xcd   : > { %v650_v1 = vsub.f32 1.0, %v618_v61  ;;  %v634_v2 = vsub.f32 1.0, %v602_v62  ;;  %v585_v3 = vsub.f32 %v1390_v21, %v496_v63  ;;  %v569_v5 = vsub.f32 %v1390_v21, %v416_v0  ;;  %983 = vmatprep.subr.mxu0 %v683_v40  ;;  %1027 = vmatprep.subr.mxu1 %v683_v40 }
  0xce   : > { %984 = vmatpush3.msra.mxu0 %v667_v60  ;;  %1043 = vmatpush3.msra.mxu1 %v667_v60 }
  0xcf   : > { %v682_v10 = vmax.f32 %v650_v1, 0.0  ;;  %v666_v13 = vmax.f32 %v634_v2, 0.0  ;;  %v617_v14 = vand.u32 2147483647, %v585_v3  ;;  %v601_v17 = vand.u32 2147483647, %v569_v5 }
  0xd0   : > { %v491_v20 = vpop.permute.xlu0 %490  ;;  %v411_v22 = vpop.permute.xlu1 %410 }
  0xd1   : > { %v649_v23 = vsub.f32 1.0, %v617_v14  ;;  %v633_v24 = vsub.f32 1.0, %v601_v17  ;;  %v584_v4 = vsub.f32 %v1390_v21, %v491_v20  ;;  %v568_v25 = vsub.f32 %v1390_v21, %v411_v22  ;;  %985 = vmatprep.subr.mxu0 %v682_v10  ;;  %1028 = vmatprep.subr.mxu1 %v682_v10 }
  0xd2   : > { %986 = vmatpush3.msra.mxu0 %v666_v13  ;;  %1044 = vmatpush3.msra.mxu1 %v666_v13 }
  0xd3   : > { %v681_v26 = vmax.f32 %v649_v23, 0.0  ;;  %v665_v30 = vmax.f32 %v633_v24, 0.0  ;;  %v616_v31 = vand.u32 2147483647, %v584_v4  ;;  %v600_v32 = vand.u32 2147483647, %v568_v25 }
  0xd5   : > { %v648_v34 = vsub.f32 1.0, %v616_v31  ;;  %v632_v8 = vsub.f32 1.0, %v600_v32  ;;  %987 = vmatprep.subr.mxu0 %v681_v26  ;;  %1029 = vmatprep.subr.mxu1 %v681_v26 }
  0xd6   : > { %988 = vmatpush3.msra.mxu0 %v665_v30  ;;  %1045 = vmatpush3.msra.mxu1 %v665_v30 }
  0xd7   : > { %v680_v35 = vmax.f32 %v648_v34, 0.0  ;;  %v664_v36 = vmax.f32 %v632_v8, 0.0 }
  0xd9   : > { %989 = vmatprep.subr.mxu0 %v680_v35  ;;  %1030 = vmatprep.subr.mxu1 %v680_v35 }
  0xda   : > { %990 = vmatpush3.msra.mxu0 %v664_v36  ;;  %1046 = vmatpush3.msra.mxu1 %v664_v36 }
  0xdb   : > { %769 = vmatmul.mubr.f32.vlgmr.msra.gmra.mxu0 %v1335_v15  ;;  %789 = vmatmul.mubr.f32.vlgmr.msra.gmra.mxu1 %v1338_v16 }
  0xdc   : > { %773 = vmatprep.mubr.f32.mxu0 %v1346_v29  ;;  %793 = vmatprep.mubr.f32.mxu1 %v1349_v33 }
  0xdf   : > { %774 = vmatmul.mubr.f32.gmra.mxu0 %v1358_v46  ;;  %794 = vmatmul.mubr.f32.gmra.mxu1 %v1361_v50 }
  0xe0   : > { %778 = vmatprep.mubr.f32.mxu0 %v1366_v6  ;;  %798 = vmatprep.mubr.f32.mxu1 %v1369_v7 }
  0xe3   : > { %779 = vmatmul.mubr.f32.gmra.mxu0 %v1372_v9  ;;  %799 = vmatmul.mubr.f32.gmra.mxu1 %v1375_v42 }
  0xe4   : > { %783 = vmatprep.mubr.f32.mxu0 %v1378_v11  ;;  %803 = vmatprep.mubr.f32.mxu1 %v1381_v12 }
  0xe7   : > { %784 = vmatmul.mubr.f32.gmra.mxu0 %v1384_v18  ;;  %804 = vmatmul.mubr.f32.gmra.mxu1 %v1387_v19 }
 0x19b   : > { %v991_v15 = vpop.f32.mrf.mxu0  ;;  %v1003_v16 = vpop.f32.mrf.mxu1 }
 0x19d   : > { %v992_v29 = vpop.f32.mrf.mxu0  ;;  %v1004_v33 = vpop.f32.mrf.mxu1 }
 0x19e   : > { %v993_v46 = vadd.f32 %v992_v29, %v991_v15  ;;  %v1005_v50 = vadd.f32 %v1004_v33, %v1003_v16 }
 0x19f   : > { %v994_v6 = vpop.f32.mrf.mxu0  ;;  %v1006_v7 = vpop.f32.mrf.mxu1 }
 0x1a0   : > { %817 = vst [vmem:[%s194_s6] sm:$0xff] %v993_v46  ;;  %821 = vst [vmem:[%s194_s6 + $0x20] sm:$0xff] %v1005_v50 }
 0x1a1   : > { %v995_v9 = vpop.f32.mrf.mxu0  ;;  %v1007_v42 = vpop.f32.mrf.mxu1 }
 0x1a2   : > { %v996_v11 = vadd.f32 %v995_v9, %v994_v6  ;;  %v1008_v12 = vadd.f32 %v1007_v42, %v1006_v7 }
 0x1a3   : > { %v997_v18 = vpop.f32.mrf.mxu0  ;;  %v1009_v19 = vpop.f32.mrf.mxu1 }
 0x1a4   : > { %818 = vst [vmem:[%s194_s6 + $0x8] sm:$0xff] %v996_v11  ;;  %822 = vst [vmem:[%s194_s6 + $0x28] sm:$0xff] %v1008_v12 }
 0x1a5   : > { %v998_v21 = vpop.f32.mrf.mxu0  ;;  %v1010_v27 = vpop.f32.mrf.mxu1 }
 0x1a6   : > { %v999_v37 = vadd.f32 %v998_v21, %v997_v18  ;;  %v1011_v38 = vadd.f32 %v1010_v27, %v1009_v19 }
 0x1a7   : > { %v1000_v39 = vpop.f32.mrf.mxu0  ;;  %v1012_v41 = vpop.f32.mrf.mxu1 }
 0x1a8   : > { %819 = vst [vmem:[%s194_s6 + $0x10] sm:$0xff] %v999_v37  ;;  %823 = vst [vmem:[%s194_s6 + $0x30] sm:$0xff] %v1011_v38 }
 0x1a9   : > { %v1001_v28 = vpop.f32.mrf.mxu0  ;;  %v1013_v43 = vpop.f32.mrf.mxu1 }
 0x1aa   : > { %v1002_v44 = vadd.f32 %v1001_v28, %v1000_v39  ;;  %v1014_v45 = vadd.f32 %v1013_v43, %v1012_v41 }
 0x1ac   : > { %820 = vst [vmem:[%s194_s6 + $0x18] sm:$0xff] %v1002_v44  ;;  %824 = vst [vmem:[%s194_s6 + $0x38] sm:$0xff] %v1014_v45 }
 0x1ad   : > { %1121 = shalt.err (!%p1118_p5)
}
 0x1ae   : > { %s1122_s26 = scalar_lea.hbm %s1445_s18, 1024  ;;  %s1126_s29 = scalar_lea.hbm %s1498_s2, 2048 }
 0x1af   : > { %p1123_p6 = scmp.ne.s32.totalorder %s1445_s18, %s1122_s26  ;;  %p1127_p10 = scmp.lt.s32.totalorder %s1445_s18, %s1498_s2 }
 0x1b0   : > { %p1128_p11 = scmp.lt.s32.totalorder %s1126_s29, %s1122_s26 }
 0x1b1   : > { %p1124_p7 = pnand %p1123_p6, %p1245_p4 }
 0x1b2   : > { %p1129_p12 = por %p1128_p11, %p1127_p10 }
 0x1b3   : > { %p1125_p9 = pneg %p1124_p7 }
 0x1b5   : > { %p1130_p13 = pnand %p1129_p12, %p1125_p9 }
 0x1b7   : > { %1133 = shalt.err (!%p1130_p13)
}
 0x1b8   : > { %s1188_s4 = smov 128   ;;  %s1189_s5 = smov 8  }
 0x1b9   : > { %1047 = dma.vmem_to_hbm [thread:$0]  (%p1245_p4), %s1447_s8, 1024, %s1445_s18, %s1451_s12, %s1188_s4, %s1188_s4, %s1189_s5  }
 0x1ba PF: > { %p1053_p0 = scmp.ge.s32.totalorder %s1184_s14, 2  ;;  %s856_s6 = sand.u32 1, %s1164_s9  }
 0x1bb   : > { %s857_s7 = scalar_lea.sflag [#allocation3], %s856_s6 }
 0x1bc   : > { %p1050_p1 = pnand %p1053_p0, %p1252_p8 }
 0x1be   : > { %p1051_p2 = pneg %p1050_p1 }
 0x1c0   : > { %1159 = dma.done.wait (%p1051_p2), %s857_s7, 1024  }
 0x1c1   : > { %1161 = vsyncadd (%p1051_p2), %s857_s7, 4294966272  ;;  %s15_s14 = sadd.s32 1, %s1184_s14   ;;  %s1501_s9 = smov %s1168_s10 }
 0x1c2   : > { %p12_p3 = scmp.ge.s32.totalorder %s15_s14, 4   ;;  %s1502_s10 = smov %s1172_s11 }
 0x1c3   : > { %s1503_s11 = smov %s1258_s22  ;;  %s1504_s12 = smov %s1180_s13 }
 0x1c4   : > { %s1505_s13 = smov %s1507_s17  ;;  %14 = sbr.rel (!%p12_p3) target bundleno = 4 (0x4), region = 70 }
 0x1c9   :  { %862 = vsyncpa [#allocation3], 1 }
 0x1ca   :  { %864 = vsyncpa [#allocation3 + $0x1], 1 }

</bundles_post_ra>
